<compile_context>
chip_gen: v6e
topology: v6e:2x2x1
jax: 0.10.0
libtpu: 0.0.40
codegen_flags: <defaults>
</compile_context>

<pallas_src>
import math
from functools import partial

import jax
import jax.numpy as jnp
from jax import lax
from jax.experimental import pallas as pl
from jax.experimental.pallas import tpu as pltpu


# ----------------------------------------------------------------------------
# Pallas kernel: x + factor * pe  (lane-dense, batch fused into the block)
# ----------------------------------------------------------------------------

_TARGET_TILE_BYTES = 2 * 1024 * 1024     # per x-tile VMEM budget (v7x-safe)
_MIN_PALLAS_BYTES_DEFAULT = 1 << 20      # below this, XLA fused add is faster


def _pe_add_kernel(x_ref, pe_ref, factor_ref, o_ref):
    # x_ref / o_ref : (B, Ft) lane-dense tile
    # pe_ref        : (1, Ft) positional-encoding tile (broadcast over batch)
    # factor_ref    : (1, 1) float32 scalar in SMEM
    factor = factor_ref[0, 0]
    o_ref[...] = (x_ref[...] + factor * pe_ref[...]).astype(o_ref.dtype)


def make_pe_window(d_model, length, start=0, max_len=10000, dtype=jnp.float32):
    """Sinusoidal PE window pe[:, :, start:start+length] of the PyTorch module,
    returned pre-flattened as (1, d_model * length) (channel-major, matching
    x.reshape(B, d_model * length))."""
    if d_model % 2 != 0:
        raise ValueError("d_model must be even")
    if start + length > max_len:
        raise ValueError(
            f"PE window out of range: start({start}) + length({length}) > max_len({max_len})")
    position = jnp.arange(start, start + length, dtype=jnp.float32)[None, :]    # (1, L)
    div_term = jnp.exp(
        jnp.arange(0, d_model, 2, dtype=jnp.float32) * (-math.log(10000.0) / d_model)
    )[:, None]                                                                   # (d/2, 1)
    ang = position * div_term                                                    # (d/2, L)
    pe = jnp.zeros((d_model, length), dtype=jnp.float32)
    pe = pe.at[0::2, :].set(jnp.sin(ang))
    pe = pe.at[1::2, :].set(jnp.cos(ang))
    return pe.reshape(1, d_model * length).astype(dtype)


def _pick_f_tile(batch, n_feat, itemsize):
    """Pick a lane-aligned feature-tile size dividing n_feat."""
    if n_feat % 128 != 0:
        return n_feat                                  # full last dim is always legal
    budget = (_TARGET_TILE_BYTES // itemsize) // max(batch, 1)
    budget = max(128, (budget // 128) * 128)
    if n_feat <= budget:
        # Prefer >=2 grid steps so v7x can shard the parallel axis across 2 TCs.
        return n_feat // 2 if n_feat % 256 == 0 else n_feat
    best = 128
    for t in range(256, budget + 1, 128):
        if n_feat % t == 0:
            best = t
    return best


def positional_encoding(x, *, start=0, factor=1.0, max_len=10000,
                        min_pallas_bytes=_MIN_PALLAS_BYTES_DEFAULT):
    """PositionalEncoding.forward (eval mode): x + factor * pe[..., start:start+L].

    x: (B, d_model, L).  Dropout is identity in eval mode.
    """
    B, d_model, L = x.shape
    n_feat = d_model * L
    pe_flat = make_pe_window(d_model, L, start=start, max_len=max_len, dtype=x.dtype)

    total_bytes = x.size * x.dtype.itemsize
    if total_bytes < min_pallas_bytes:
        # Tiny tensors: fused XLA elementwise add beats kernel-launch overhead.
        return x + factor * pe_flat.reshape(1, d_model, L)

    itemsize = x.dtype.itemsize
    x2 = x.reshape(B, n_feat)                          # lane-dense 2-D view (free reshape)
    ft = _pick_f_tile(B, n_feat, itemsize)
    nf = n_feat // ft
    factor_arr = jnp.full((1, 1), factor, dtype=jnp.float32)

    cost = pl.CostEstimate(
        flops=2 * B * n_feat,
        transcendentals=0,
        bytes_accessed=(2 * B * n_feat + n_feat) * itemsize,
    )

    out2 = pl.pallas_call(
        _pe_add_kernel,
        out_shape=jax.ShapeDtypeStruct((B, n_feat), x.dtype),
        grid_spec=pltpu.PrefetchScalarGridSpec(
            num_scalar_prefetch=0,
            grid=(nf,),
            in_specs=[
                pl.BlockSpec((B, ft), lambda f: (0, f)),   # x: full batch, feature tile f
                pl.BlockSpec((1, ft), lambda f: (0, f)),   # pe: fetched once per tile
                pl.BlockSpec(memory_space=pltpu.SMEM),     # scalar factor
            ],
            out_specs=pl.BlockSpec((B, ft), lambda f: (0, f)),
        ),
        compiler_params=pltpu.CompilerParams(
            dimension_semantics=("parallel",),
            vmem_limit_bytes=32 * 1024 * 1024,
        ),
        cost_estimate=cost,
    )(x2, pe_flat, factor_arr)
    return out2.reshape(B, d_model, L)


# ----------------------------------------------------------------------------
# Plain-JAX building blocks for the rest of PositionalUNet (glue around kernel)
# ----------------------------------------------------------------------------

def conv1d(x, w, b=None, padding=0):
    """x: (B, Cin, L), w: (Cout, Cin, K)."""
    out = lax.conv_general_dilated(
        x, w, window_strides=(1,), padding=[(padding, padding)],
        dimension_numbers=("NCH", "OIH", "NCH"))
    if b is not None:
        out = out + b[None, :, None]
    return out


def batchnorm1d(x, p, eps=1e-5):
    """Eval-mode BatchNorm1d with running stats."""
    inv = lax.rsqrt(p["var"] + eps)
    return (x - p["mean"][None, :, None]) * (inv * p["gamma"])[None, :, None] \
        + p["beta"][None, :, None]


def leaky_relu(x):
    return jax.nn.leaky_relu(x, negative_slope=0.01)


def maxpool1d(x, k=2):
    return lax.reduce_window(x, -jnp.inf, lax.max, (1, 1, k), (1, 1, k), "VALID")


def upsample_linear_x2(x):
    """nn.Upsample(scale_factor=2, mode='linear', align_corners=True)."""
    B, C, L = x.shape
    Lo = 2 * L
    if L == 1:
        return jnp.broadcast_to(x, (B, C, Lo))
    pos = jnp.arange(Lo, dtype=jnp.float32) * (L - 1) / (Lo - 1)
    lo = jnp.floor(pos).astype(jnp.int32)
    hi = jnp.minimum(lo + 1, L - 1)
    w = pos - lo.astype(jnp.float32)
    return x[:, :, lo] * (1.0 - w) + x[:, :, hi] * w


def double_conv(x, p):
    x = conv1d(x, p["conv1"]["w"], padding=5)
    x = leaky_relu(batchnorm1d(x, p["bn1"]))
    x = conv1d(x, p["conv2"]["w"], padding=3)
    x = leaky_relu(batchnorm1d(x, p["bn2"]))
    return x


def down(x, p):
    return double_conv(maxpool1d(x), p)


def up(x1, x2, p):
    x1 = upsample_linear_x2(x1)
    diff = x2.shape[2] - x1.shape[2]
    if diff != 0:
        x1 = jnp.pad(x1, ((0, 0), (0, 0), (diff // 2, diff - diff // 2)))
    return double_conv(jnp.concatenate([x2, x1], axis=1), p)


def _minmax_norm(o):
    """Per-batch (o - min) / (max - min) over channel-0 signal, as in the module."""
    mn = jnp.min(o, axis=(1, 2), keepdims=True)
    mx = jnp.max(o, axis=(1, 2), keepdims=True)
    return (o - mn) / (mx - mn)


# ----------------------------------------------------------------------------
# Parameters
# ----------------------------------------------------------------------------

def _conv_init(key, in_ch, out_ch, k, bias=True):
    wkey, bkey = jax.random.split(key)
    bound = 1.0 / math.sqrt(in_ch * k)
    p = {"w": jax.random.uniform(wkey, (out_ch, in_ch, k), jnp.float32, -bound, bound)}
    if bias:
        p["b"] = jax.random.uniform(bkey, (out_ch,), jnp.float32, -bound, bound)
    return p


def _bn_init(ch):
    return {"gamma": jnp.ones((ch,), jnp.float32), "beta": jnp.zeros((ch,), jnp.float32),
            "mean": jnp.zeros((ch,), jnp.float32), "var": jnp.ones((ch,), jnp.float32)}


def init_params(key, multi=40):
    keys = iter(jax.random.split(key, 64))

    def dconv(in_ch, out_ch, mid=None):
        mid = mid if mid is not None else out_ch
        return {
            "conv1": _conv_init(next(keys), in_ch, mid, 11, bias=False),
            "bn1": _bn_init(mid),
            "conv2": _conv_init(next(keys), mid, out_ch, 7, bias=False),
            "bn2": _bn_init(out_ch),
        }

    f = 2  # bilinear factor
    return {
        "inc":   dconv(1, multi),
        "down1": dconv(multi, multi * 2),
        "down2": dconv(multi * 2, multi * 4),
        "down3": dconv(multi * 4, multi * 8),
        "down4": dconv(multi * 8, multi * 16 // f),
        "fc_mean": _conv_init(next(keys), multi * 16 // f, multi * 16 // f, 1),
        "fc_var":  _conv_init(next(keys), multi * 16 // f, multi * 16 // f, 1),
        "up1": dconv(multi * 16, multi * 8 // f, mid=multi * 16 // 2),
        "up2": dconv(multi * 8, multi * 4 // f, mid=multi * 8 // 2),
        "up3": dconv(multi * 4, multi * 2 // f, mid=multi * 4 // 2),
        "up4": dconv(multi * 2, multi // f, mid=multi * 2 // 2),
        "outc": _conv_init(next(keys), multi // f, 1, 1),
    }


# ----------------------------------------------------------------------------
# PositionalUNet forward
# ----------------------------------------------------------------------------

def positional_unet_forward(params, x, key, *, multi=40,
                            pe_min_pallas_bytes=_MIN_PALLAS_BYTES_DEFAULT):
    """x: (B, 1, L) with L divisible by 16. Returns (B, 1, L) in [0, 1]."""
    pe = partial(positional_encoding, min_pallas_bytes=pe_min_pallas_bytes)

    x1 = pe(double_conv(x, params["inc"]), start=0)          # pe1 (d=multi)
    x2 = pe(down(x1, params["down1"]), start=0)               # pe2
    x3 = pe(down(x2, params["down2"]), start=0)               # pe3
    x4 = pe(down(x3, params["down3"]), start=0)               # pe4
    x5 = down(x4, params["down4"])

    mu = conv1d(x5, params["fc_mean"]["w"], params["fc_mean"]["b"])
    logvar = conv1d(x5, params["fc_var"]["w"], params["fc_var"]["b"])
    eps = jax.random.normal(key, mu.shape, mu.dtype)          # reparametrize
    z = eps * jnp.exp(0.5 * logvar) + mu
    x5 = pe(z, start=0)                                       # pe5

    xu = pe(up(x5, x4, params["up1"]), start=multi * 4)       # pe6
    xu = pe(up(xu, x3, params["up2"]), start=multi * 2)       # pe7
    xu = pe(up(xu, x2, params["up3"]), start=multi * 2)       # pe8
    xu = up(xu, x1, params["up4"])                            # (pe9 unused in forward)

    out = conv1d(xu, params["outc"]["w"], params["outc"]["b"])
    return _minmax_norm(out)


# ----------------------------------------------------------------------------
# Demo / checks
# ----------------------------------------------------------------------------

if __name__ == "__main__":
    root = jax.random.PRNGKey(0)
    k_params, k_x, k_eps, k_t1, k_t2 = jax.random.split(root, 5)

    # 1) Direct check of the Pallas PE kernel (forced Pallas path, tiled grid).
    xt = jax.random.normal(k_t1, (2, 80, 128), jnp.float32)
    got = jax.block_until_ready(
        positional_encoding(xt, start=80, factor=0.5, min_pallas_bytes=0))
    ref = xt + 0.5 * make_pe_window(80, 128, start=80).reshape(1, 80, 128)
    assert got.shape == xt.shape
    assert jnp.allclose(got, ref, atol=1e-6), "PE kernel mismatch (tiled path)"

    # Non-128-multiple feature size exercises the full-block fallback.
    xo = jax.random.normal(k_t2, (2, 40, 50), jnp.float32)
    got_o = jax.block_until_ready(
        positional_encoding(xo, start=3, factor=1.0, min_pallas_bytes=0))
    ref_o = xo + make_pe_window(40, 50, start=3).reshape(1, 40, 50)
    assert jnp.allclose(got_o, ref_o, atol=1e-6), "PE kernel mismatch (full-block path)"

    # 2) Full PositionalUNet forward at small shapes; compare the Pallas PE path
    #    against the pure-XLA PE path end to end.
    B, L = 2, 256
    x = jax.random.normal(k_x, (B, 1, L), jnp.float32)
    params = init_params(k_params)

    fwd_pallas = jax.jit(partial(positional_unet_forward, pe_min_pallas_bytes=0))
    fwd_xla = jax.jit(partial(positional_unet_forward, pe_min_pallas_bytes=1 << 60))

    out_p = jax.block_until_ready(fwd_pallas(params, x, k_eps))
    out_x = jax.block_until_ready(fwd_xla(params, x, k_eps))

    assert out_p.shape == (B, 1, L)
    assert bool(jnp.all(jnp.isfinite(out_p)))
    assert jnp.allclose(out_p, out_x, atol=1e-4, rtol=1e-4), \
        "UNet forward: Pallas PE path vs XLA PE path mismatch"
    assert jnp.allclose(jnp.min(out_p, axis=(1, 2)), 0.0, atol=1e-5)
    assert jnp.allclose(jnp.max(out_p, axis=(1, 2)), 1.0, atol=1e-5)

    print("KERNEL_OK")
</pallas_src>

<mosaic_0001>
module attributes {stable_mosaic.version = 11 : i64} {
  func.func @_pe_add_kernel(%arg0: i32, %arg1: memref<2x5120xf32, #tpu.memory_space<vmem>>, %arg2: memref<1x5120xf32, #tpu.memory_space<vmem>>, %arg3: memref<1x1xf32, #tpu.memory_space<smem>>, %arg4: memref<2x5120xf32, #tpu.memory_space<vmem>>) attributes {dimension_semantics = [#tpu.dimension_semantics<parallel>], iteration_bounds = array<i64: 2>, scalar_prefetch = 0 : i64, scratch_operands = 0 : i64, tpu.core_type = #tpu.core_type<tc>, window_params = [{transform_indices = @transform_0, window_bounds = array<i64: 2, 5120>}, {transform_indices = @transform_1, window_bounds = array<i64: 1, 5120>}, {transform_indices = @transform_2, window_bounds = array<i64: 1, 1>}, {transform_indices = @transform_3, window_bounds = array<i64: 2, 5120>}]} {
    %c0 = arith.constant 0 : index
    %c0_0 = arith.constant 0 : index
    %0 = memref.load %arg3[%c0, %c0_0] : memref<1x1xf32, #tpu.memory_space<smem>>
    %c0_1 = arith.constant 0 : index
    %c0_2 = arith.constant 0 : index
    %1 = vector.load %arg1[%c0_1, %c0_2] : memref<2x5120xf32, #tpu.memory_space<vmem>>, vector<2x5120xf32>
    %c0_3 = arith.constant 0 : index
    %c0_4 = arith.constant 0 : index
    %2 = vector.load %arg2[%c0_3, %c0_4] : memref<1x5120xf32, #tpu.memory_space<vmem>>, vector<1x5120xf32>
    %3 = vector.broadcast %0 : f32 to vector<1x5120xf32>
    %4 = arith.mulf %3, %2 : vector<1x5120xf32>
    %5 = vector.broadcast %4 : vector<1x5120xf32> to vector<2x5120xf32>
    %6 = arith.addf %1, %5 : vector<2x5120xf32>
    %c0_5 = arith.constant 0 : index
    %c0_6 = arith.constant 0 : index
    %7 = vector.load %arg4[%c0_5, %c0_6] : memref<2x5120xf32, #tpu.memory_space<vmem>>, vector<2x5120xf32>
    tpu.vector_store %arg4[%c0_5, %c0_6], %6 {strides = array<i32>} : memref<2x5120xf32, #tpu.memory_space<vmem>>, vector<2x5120xf32>,
    return
  }
  func.func @transform_0(%arg0: i32) -> (i32, i32) {
    %c0_i32 = arith.constant 0 : i32
    %c0_i32_0 = arith.constant 0 : i32
    return %c0_i32, %arg0 : i32, i32
  }
  func.func @transform_1(%arg0: i32) -> (i32, i32) {
    %c0_i32 = arith.constant 0 : i32
    %c0_i32_0 = arith.constant 0 : i32
    return %c0_i32, %arg0 : i32, i32
  }
  func.func @transform_2(%arg0: i32) -> (i32, i32) {
    %c0_i32 = arith.constant 0 : i32
    %c0_i32_0 = arith.constant 0 : i32
    %c0_i32_1 = arith.constant 0 : i32
    return %c0_i32, %c0_i32_0 : i32, i32
  }
  func.func @transform_3(%arg0: i32) -> (i32, i32) {
    %c0_i32 = arith.constant 0 : i32
    %c0_i32_0 = arith.constant 0 : i32
    return %c0_i32, %arg0 : i32, i32
  }
}

</mosaic_0001>

<bundles_post_ra>
// kernel: tpu_custom_call.1
= control target key start
LH: loop header
LB: loop body
LE: loop exit
PB: predicated region body
PF: predicated region fallthrough
CT: control target
= control target key end

     0   :  { %s1246_s0 = inlined_call_operand.hbm [shape: f32[2,10240], index: 0, kind: input, shape index: {}]   ;;  %s1247_s1 = inlined_call_operand.hbm [shape: f32[1,10240], index: 1, kind: input, shape index: {}]   ;;  %s1248_s2 = inlined_call_operand.<no memory space> [shape: f32[1,1], index: 2, kind: input, shape index: {}]   ;;  %s1249_s3 = inlined_call_operand.hbm [shape: f32[2,10240], index: 3, kind: output, shape index: {}]  }
   0x1   :  { %8 = sst [smem:[#allocation2]] %s1248_s2 }
   0x2   :  { %9 = vsyncpa [#allocation4], 0 }
   0x3   :  { %11 = vsyncpa [#allocation4 + $0x1], 0 }
   0x4   :  { %12 = vsyncpa [#allocation7], 0 }
   0x5   :  { %14 = vsyncpa [#allocation7 + $0x1], 0 }
   0x6   :  { %15 = vsyncpa [#allocation5], 0 }
   0x7   :  { %17 = vsyncpa [#allocation5 + $0x1], 0  ;;  %s945_s14 = smov 0   ;;  %s947_s15 = smov 0  }
   0x8   :  { %s949_s16 = smov 0   ;;  %s951_s17 = smov 0  }
   0x9 LB: > { %s966_s2 = sadd.s32 4294967295, %s916_s17   ;;  %s724_s18 = sadd.s32 4294967294, %s916_s17   ;;  %s916_s17 = sphi %s951_s17, %s1267_s17   ;;  %s912_s16 = sphi %s949_s16, %s1266_s16   ;;  %s908_s15 = sphi %s947_s15, %s1265_s15   ;;  %s904_s14 = sphi %s945_s14, %s1264_s14  }
   0xa   : > { %s970_s19 = sadd.s32 1, %s916_s17   ;;  %s30_s20 = sadd.s32 1, %s912_s16 }
   0xb   : > { %s27_s21 = ssub.s32 %s916_s17, %s970_s19  ;;  %p37_p0 = scmp.ne.s32.totalorder %s912_s16, %s908_s15 }
   0xc   : > { %p28_p1 = scmp.eq.s32.totalorder %s27_s21, 0  ;;  %p38_p2 = scmp.eq.s32.totalorder %s916_s17, 0 }
   0xd   : > { %p43_p3 = scmp.ne.s32.totalorder %s908_s15, %s904_s14  ;;  %p44_p4 = scmp.eq.s32.totalorder %s966_s2, 0 }
   0xe   : > { %s982_s22 = scalar_select %p28_p1, %s912_s16, %s30_s20  }
   0xf   : > { %p39_p5 = por %p38_p2, %p37_p0  ;;  %p984_p6 = por %p44_p4, %p43_p3 }
  0x10   : > { %p114_p7 = scmp.eq.s32.totalorder %s966_s2, 1  ;;  %p120_p8 = scmp.eq.s32.totalorder %s724_s18, 1 }
  0x11   : > { %s1252_s23 = scalar_select %p984_p6, 1, 0 }
  0x12   : > { %p757_p10 = scmp.lt.s32.totalorder %s916_s17, 2  ;;  %p991_p11 = por %p114_p7, %p37_p0 }
  0x13   : > { %p995_p12 = por %p120_p8, %p43_p3  ;;  %s1000_s26 = sand.u32 1, %s912_s16  }
  0x14   : > { %s1253_s24 = scalar_select %p991_p11, 1, 0 }
  0x15   : > { %s1254_s25 = scalar_select %p995_p12, 1, 0 }
  0x16   : > { %s733_s27 = smul.u32 1280, %s916_s17  ;;  %p1009_p13 = pnand %p757_p10, %p39_p5 }
  0x17   : > { %s736_s28 = smul.u32 80, %s1000_s26  ;;  %s144_s8 = scalar_lea.sflag [#allocation4], %s1000_s26 }
  0x18   : > { %s1007_s4 = scalar_lea.hbm %s1246_s0, %s733_s27  ;;  %p794_p3 = pneg %p1009_p13 }
  0x19   : > { %s147_s6 = scalar_lea.vmem [#allocation3], %s736_s28  ;;  %s792_s9 = scalar_lea.hbm %s1007_s4, 1280 }
  0x1a   : > { %s155_s7 = sshll.u32 %s147_s6, 4  ;;  %p793_p2 = scmp.ne.s32.totalorder %s1007_s4, %s792_s9  ;;  %s156_s7 = int_to_ptr.vmem [resolvable:$true] %s155_s7 }
  0x1b   : > { %s797_s12 = scalar_lea.hbm %s1246_s0, 2560  ;;  %p798_p5 = scmp.lt.s32.totalorder %s1007_s4, %s1246_s0 }
  0x1c   : > { %p795_p4 = pnand %p794_p3, %p793_p2  ;;  %p799_p8 = scmp.lt.s32.totalorder %s797_s12, %s792_s9 }
  0x1e   : > { %p796_p7 = pneg %p795_p4  ;;  %p800_p10 = por %p799_p8, %p798_p5 }
  0x20   : > { %p801_p9 = pnand %p800_p10, %p796_p7 }
  0x22   : > { %804 = shalt.err (!%p801_p9)
}
  0x23   : > { %s805_s20 = scalar_lea.vmem %s156_s7, 1280  ;;  %s918_s21 = smov [#allocation3]  }
  0x24   : > { %p806_p0 = scmp.ne.s32.totalorder %s156_s7, %s805_s20  ;;  %s810_s27 = sshll.u32 %s918_s21, 4  ;;  %s811_s27 = int_to_ptr.vmem [resolvable:$false] %s810_s27 }
  0x25   : > { %s812_s28 = scalar_lea.vmem %s811_s27, 2560  ;;  %p813_p4 = scmp.lt.s32.totalorder %s156_s7, %s811_s27 }
  0x26   : > { %p808_p1 = pnand %p806_p0, %p794_p3  ;;  %p814_p12 = scmp.lt.s32.totalorder %s812_s28, %s805_s20 }
  0x28   : > { %p809_p2 = pneg %p808_p1  ;;  %p815_p11 = por %p814_p12, %p813_p4 }
  0x2a   : > { %p816_p6 = pnand %p815_p11, %p809_p2 }
  0x2c   : > { %819 = shalt.err (!%p816_p6)
}
  0x2d   : > { %749 = dma.hbm_to_vmem [thread:$0]  (!%p1009_p13), %s1007_s4, 1280, %s156_s7, %s144_s8  }
  0x2e   : > { %p1256_p9 = scmp.lt.s32.totalorder %s916_s17, 3  ;;  %p1257_p0 = scmp.ge.s32.totalorder %s916_s17, 1 }
  0x2f   : > { %s737_s30 = smul.u32 40, %s1000_s26  ;;  %s163_s4 = scalar_lea.sflag [#allocation7], %s1000_s26 }
  0x30   : > { %p1040_p1 = pnand %p1257_p0, %p1256_p9  ;;  %s734_s6 = smul.u32 640, %s916_s17 }
  0x31   : > { %s166_s12 = scalar_lea.vmem [#allocation6], %s737_s30  ;;  %s825_s20 = scalar_lea.hbm %s1247_s1, 1280 }
  0x32   : > { %s1258_s29 = scalar_select %p1040_p1, 1, 0 }
  0x33   : > { %s1049_s11 = scalar_lea.hbm %s1247_s1, %s734_s6  ;;  %s174_s13 = sshll.u32 %s166_s12, 4  ;;  %s175_s13 = int_to_ptr.vmem [resolvable:$true] %s174_s13 }
  0x34   : > { %s820_s7 = scalar_lea.hbm %s1049_s11, 640  ;;  %p826_p7 = scmp.lt.s32.totalorder %s1049_s11, %s1247_s1 }
  0x35   : > { %p821_p6 = scmp.ne.s32.totalorder %s1049_s11, %s820_s7  ;;  %p827_p5 = scmp.lt.s32.totalorder %s825_s20, %s820_s7 }
  0x37   : > { %p823_p11 = pnand %p821_p6, %p794_p3  ;;  %p828_p8 = por %p827_p5, %p826_p7 }
  0x39   : > { %p824_p12 = pneg %p823_p11 }
  0x3b   : > { %p829_p10 = pnand %p828_p8, %p824_p12 }
  0x3d   : > { %832 = shalt.err (!%p829_p10)
}
  0x3e   : > { %s833_s28 = scalar_lea.vmem %s175_s13, 640  ;;  %s919_s26 = smov [#allocation6]  }
  0x3f   : > { %p834_p2 = scmp.ne.s32.totalorder %s175_s13, %s833_s28  ;;  %s838_s30 = sshll.u32 %s919_s26, 4  ;;  %s839_s30 = int_to_ptr.vmem [resolvable:$false] %s838_s30 }
  0x40   : > { %s840_s6 = scalar_lea.vmem %s839_s30, 1280  ;;  %p841_p0 = scmp.lt.s32.totalorder %s175_s13, %s839_s30 }
  0x41   : > { %p836_p4 = pnand %p834_p2, %p794_p3  ;;  %p842_p6 = scmp.lt.s32.totalorder %s840_s6, %s833_s28 }
  0x43   : > { %p837_p9 = pneg %p836_p4  ;;  %p843_p11 = por %p842_p6, %p841_p0 }
  0x45   : > { %p844_p1 = pnand %p843_p11, %p837_p9 }
  0x47   : > { %847 = shalt.err (!%p844_p1)
}
  0x48   : > { %752 = dma.hbm_to_vmem [thread:$0]  (!%p1009_p13), %s1049_s11, 640, %s175_s13, %s163_s4  }
  0x49   : > { %p1259_p12 = scmp.ne.s32.totalorder %s1258_s29, 0 }
  0x4a   : > { %s1073_s9 = sand.u32 (!%p1259_p12), 1, %s908_s15   ;;  %p1260_p3 = scmp.ne.s32.totalorder (!%p1259_p12), %s1252_s23, 0 }
  0x4b   : > { %183 = sbr.rel (%p1259_p12) target bundleno = 138 (0x8a), region = 32  ;;  %s186_s12 = scalar_lea.sflag (!%p1259_p12), [#allocation4], %s1073_s9 }
  0x4c   : > { %s738_s10 = smul.u32 (!%p1259_p12), 80, %s1073_s9 }
  0x4e   : > { %s1079_s7 = scalar_lea.vmem (!%p1259_p12), [#allocation3], %s738_s10 }
  0x50   : > { %891 = dma.done.wait (%p1260_p3), %s186_s12, 1280  }
  0x51   : > { %893 = vsyncadd (%p1260_p3), %s186_s12, 4294966016  ;;  %s739_s5 = smul.u32 40, %s1073_s9  ;;  %s195_s29 = scalar_lea.sflag [#allocation7], %s1073_s9 }
  0x53   : > { %s1087_s11 = scalar_lea.vmem [#allocation6], %s739_s5 }
  0x54   : > { %895 = dma.done.wait (%p1260_p3), %s195_s29, 640  }
  0x55   : > { %897 = vsyncadd (%p1260_p3), %s195_s29, 4294966656  ;;  %v256_v0 = vlaneseq  ;;  %s229_s13 = sld [smem:[#allocation2]]  ;;  %v920_v1 = vmov 1983009808   ;;  %v240_v10 = vld [vmem:[%s1087_s11] sm:$0xff]  ;;  %v241_v16 = vld [vmem:[%s1087_s11 + $0x8] sm:$0xff] }
  0x56   : > { %v419_v2 = vunpack.c.l.s4 %v920_v1  ;;  %v242_v39 = vld [vmem:[%s1087_s11 + $0x10] sm:$0xff]  ;;  %v230_v40 = vld [vmem:[%s1079_s7] sm:$0xff]  ;;  %v243_v45 = vld [vmem:[%s1087_s11 + $0x18] sm:$0xff]  ;;  %s1147_s23 = scalar_lea.vmem [#allocation8], %s738_s10  ;;  %s735_s4 = smul.u32 1280, %s966_s2 }
  0x57   : > { %v257_v3 = vshrl.u32 %v256_v0, 7  ;;  %v244_v46 = vld [vmem:[%s1087_s11 + $0x20] sm:$0xff]  ;;  %v231_v48 = vld [vmem:[%s1079_s7 + $0x8] sm:$0xff]  ;;  %v232_v57 = vld [vmem:[%s1079_s7 + $0x10] sm:$0xff]  ;;  %s631_s8 = sshll.u32 %s1147_s23, 4  ;;  %s617_s27 = scalar_lea.sflag [#allocation5], %s1073_s9  ;;  %s632_s8 = int_to_ptr.vmem [resolvable:$true] %s631_s8 }
  0x58   : > { %v420_v5 = vunpack.c.0.s8 %v419_v2  ;;  %s629_s21 = scalar_lea.hbm %s1249_s3, %s735_s4  ;;  %s848_s28 = scalar_lea.vmem %s632_s8, 1280 }
  0x59   : > { %v1093_v4 = vsub.s32 0, %v257_v3  ;;  %v1095_v6 = vsub.s32 1, %v257_v3  ;;  %v1097_v7 = vsub.s32 2, %v257_v3  ;;  %v1099_v8 = vsub.s32 3, %v257_v3  ;;  %p849_p13 = scmp.ne.s32.totalorder %s632_s8, %s848_s28  ;;  %p1261_p1 = scmp.ne.s32.totalorder %s1253_s24, 0 }
  0x5a   : > { %v1101_v9 = vsub.s32 4, %v257_v3  ;;  %v1104_v12 = vsub.s32 5, %v257_v3  ;;  %v1106_v13 = vsub.s32 6, %v257_v3  ;;  %v1108_v14 = vsub.s32 7, %v257_v3  ;;  %s921_s2 = smov [#allocation8]  }
  0x5b   : > { %v245_v11 = vstv %s229_s13  ;;  %v1111_v17 = vsub.s32 %v420_v5, %v257_v3  ;;  %p850_p7 = pnand %p849_p13, %p1261_p1  ;;  %s852_s26 = sshll.u32 %s921_s2, 4  ;;  %s853_s26 = int_to_ptr.vmem [resolvable:$false] %s852_s26 }
  0x5c   : > { %v246_v15 = vmul.f32 %v245_v11, %v240_v10  ;;  %v247_v18 = vmul.f32 %v245_v11, %v241_v16  ;;  %v248_v55 = vmul.f32 %v245_v11, %v242_v39  ;;  %v249_v59 = vmul.f32 %v245_v11, %v243_v45  ;;  %s854_s30 = scalar_lea.vmem %s853_s26, 2560  ;;  %p855_p8 = scmp.lt.s32.totalorder %s632_s8, %s853_s26 }
  0x5d   : > { %v1141_v60 = vmul.f32 %v245_v11, %v244_v46  ;;  %v233_v11 = vld [vmem:[%s1079_s7 + $0x18] sm:$0xff]  ;;  %p851_p5 = pneg %p850_p7  ;;  %p856_p10 = scmp.lt.s32.totalorder %s854_s30, %s848_s28 }
  0x5e   : > { %v259_v19 = vrot.slane %v246_v15, %v1093_v4  ;;  %v263_v20 = vrot.slane %v246_v15, %v1095_v6  ;;  %v267_v21 = vrot.slane %v246_v15, %v1097_v7  ;;  %v271_v22 = vrot.slane %v246_v15, %v1099_v8 }
  0x5f   : > { %v275_v23 = vrot.slane %v246_v15, %v1101_v9  ;;  %v279_v24 = vrot.slane %v246_v15, %v1104_v12  ;;  %v283_v25 = vrot.slane %v246_v15, %v1106_v13  ;;  %v287_v26 = vrot.slane %v246_v15, %v1108_v14  ;;  %p857_p2 = por %p856_p10, %p855_p8 }
  0x60   : > { %v416_v27 = vcombine.low %v259_v19, %v263_v20  ;;  %v417_v28 = vcombine.low %v267_v21, %v271_v22  ;;  %v291_v29 = vrot.slane %v247_v18, %v1093_v4  ;;  %v295_v30 = vrot.slane %v247_v18, %v1095_v6 }
  0x61   : > { %v433_v31 = vcombine.low %v275_v23, %v279_v24  ;;  %v434_v32 = vcombine.low %v283_v25, %v287_v26  ;;  %v299_v33 = vrot.slane %v247_v18, %v1097_v7  ;;  %v303_v34 = vrot.slane %v247_v18, %v1099_v8  ;;  %p858_p4 = pnand %p857_p2, %p851_p5 }
  0x62   : > { %v424_v35 = vrot.slane %v416_v27, %v1111_v17  ;;  %v431_v36 = vrot.slane %v417_v28, %v1111_v17  ;;  %v450_v37 = vcombine.low %v291_v29, %v295_v30  ;;  %v307_v38 = vrot.slane %v247_v18, %v1101_v9 }
  0x63   : > { %v441_v41 = vrot.slane %v433_v31, %v1111_v17  ;;  %v448_v42 = vrot.slane %v434_v32, %v1111_v17  ;;  %v451_v43 = vcombine.low %v299_v33, %v303_v34  ;;  %v311_v44 = vrot.slane %v247_v18, %v1104_v12  ;;  %v234_v31 = vld [vmem:[%s1079_s7 + $0x20] sm:$0xff] }
  0x64   : > { %v432_v47 = vcombine.low %v424_v35, %v431_v36  ;;  %v458_v49 = vrot.slane %v450_v37, %v1111_v17  ;;  %v315_v50 = vrot.slane %v247_v18, %v1106_v13  ;;  %v319_v51 = vrot.slane %v247_v18, %v1108_v14 }
  0x65   : > { %v449_v52 = vcombine.low %v441_v41, %v448_v42  ;;  %v465_v53 = vrot.slane %v451_v43, %v1111_v17  ;;  %v467_v54 = vcombine.low %v307_v38, %v311_v44  ;;  %v323_v0 = vrot.slane %v248_v55, %v1093_v4 }
  0x66   : > { %v596_v56 = vadd.f32 %v432_v47, %v230_v40  ;;  %v468_v58 = vcombine.low %v315_v50, %v319_v51  ;;  %v327_v2 = vrot.slane %v248_v55, %v1095_v6  ;;  %v331_v3 = vrot.slane %v248_v55, %v1097_v7  ;;  %v235_v40 = vld [vmem:[%s1079_s7 + $0x28] sm:$0xff] }
  0x67   : > { %v597_v61 = vadd.f32 %v449_v52, %v231_v48  ;;  %v466_v62 = vcombine.low %v458_v49, %v465_v53  ;;  %v475_v63 = vrot.slane %v467_v54, %v1111_v17  ;;  %v335_v5 = vrot.slane %v248_v55, %v1099_v8 }
  0x68   : > { %606 = vst [vmem:[%s1147_s23] sm:$0xff] %v596_v56  ;;  %v482_v1 = vrot.slane %v468_v58, %v1111_v17  ;;  %v339_v15 = vrot.slane %v248_v55, %v1101_v9  ;;  %v343_v16 = vrot.slane %v248_v55, %v1104_v12  ;;  %v347_v18 = vrot.slane %v248_v55, %v1106_v13 }
  0x69   : > { %607 = vst [vmem:[%s1147_s23 + $0x8] sm:$0xff] %v597_v61  ;;  %v598_v10 = vadd.f32 %v466_v62, %v232_v57  ;;  %v484_v20 = vcombine.low %v323_v0, %v327_v2  ;;  %v485_v21 = vcombine.low %v331_v3, %v335_v5  ;;  %v351_v22 = vrot.slane %v248_v55, %v1108_v14 }
  0x6a   : > { %v483_v19 = vcombine.low %v475_v63, %v482_v1  ;;  %v501_v23 = vcombine.low %v339_v15, %v343_v16  ;;  %v355_v24 = vrot.slane %v249_v59, %v1093_v4  ;;  %v359_v25 = vrot.slane %v249_v59, %v1095_v6  ;;  %v238_v1 = vld [vmem:[%s1079_s7 + $0x40] sm:$0xff] }
  0x6b   : > { %608 = vst [vmem:[%s1147_s23 + $0x10] sm:$0xff] %v598_v10  ;;  %v363_v26 = vrot.slane %v249_v59, %v1097_v7  ;;  %v492_v28 = vrot.slane %v484_v20, %v1111_v17  ;;  %v499_v29 = vrot.slane %v485_v21, %v1111_v17  ;;  %v502_v30 = vcombine.low %v347_v18, %v351_v22 }
  0x6c   : > { %v599_v27 = vadd.f32 %v483_v19, %v233_v11  ;;  %v509_v32 = vrot.slane %v501_v23, %v1111_v17  ;;  %v367_v33 = vrot.slane %v249_v59, %v1099_v8  ;;  %v518_v34 = vcombine.low %v355_v24, %v359_v25 }
  0x6d   : > { %v371_v35 = vrot.slane %v249_v59, %v1101_v9  ;;  %v500_v36 = vcombine.low %v492_v28, %v499_v29  ;;  %v516_v37 = vrot.slane %v502_v30, %v1111_v17  ;;  %v375_v38 = vrot.slane %v249_v59, %v1104_v12 }
  0x6e   : > { %609 = vst [vmem:[%s1147_s23 + $0x18] sm:$0xff] %v599_v27  ;;  %v379_v39 = vrot.slane %v249_v59, %v1106_v13  ;;  %v519_v41 = vcombine.low %v363_v26, %v367_v33  ;;  %v526_v42 = vrot.slane %v518_v34, %v1111_v17  ;;  %v383_v43 = vrot.slane %v249_v59, %v1108_v14 }
  0x6f   : > { %v387_v44 = vrot.slane %v1141_v60, %v1093_v4  ;;  %v600_v45 = vadd.f32 %v500_v36, %v234_v31  ;;  %v517_v46 = vcombine.low %v509_v32, %v516_v37  ;;  %v535_v47 = vcombine.low %v371_v35, %v375_v38  ;;  %v236_v4 = vld [vmem:[%s1079_s7 + $0x30] sm:$0xff] }
  0x70   : > { %v391_v48 = vrot.slane %v1141_v60, %v1095_v6  ;;  %v533_v49 = vrot.slane %v519_v41, %v1111_v17  ;;  %v536_v50 = vcombine.low %v379_v39, %v383_v43  ;;  %v395_v51 = vrot.slane %v1141_v60, %v1097_v7 }
  0x71   : > { %v399_v52 = vrot.slane %v1141_v60, %v1099_v8  ;;  %610 = vst [vmem:[%s1147_s23 + $0x20] sm:$0xff] %v600_v45  ;;  %v601_v53 = vadd.f32 %v517_v46, %v235_v40  ;;  %v543_v54 = vrot.slane %v535_v47, %v1111_v17  ;;  %v403_v6 = vrot.slane %v1141_v60, %v1101_v9  ;;  %v237_v8 = vld [vmem:[%s1079_s7 + $0x38] sm:$0xff] }
  0x72   : > { %v552_v55 = vcombine.low %v387_v44, %v391_v48  ;;  %v534_v56 = vcombine.low %v526_v42, %v533_v49  ;;  %v550_v57 = vrot.slane %v536_v50, %v1111_v17  ;;  %v407_v7 = vrot.slane %v1141_v60, %v1104_v12 }
  0x73   : > { %v553_v58 = vcombine.low %v395_v51, %v399_v52  ;;  %611 = vst [vmem:[%s1147_s23 + $0x28] sm:$0xff] %v601_v53  ;;  %v411_v61 = vrot.slane %v1141_v60, %v1106_v13  ;;  %v415_v9 = vrot.slane %v1141_v60, %v1108_v14  ;;  %v239_v60 = vld [vmem:[%s1079_s7 + $0x48] sm:$0xff] }
  0x74   : > { %v560_v59 = vrot.slane %v552_v55, %v1111_v17  ;;  %v602_v62 = vadd.f32 %v534_v56, %v236_v4  ;;  %v551_v63 = vcombine.low %v543_v54, %v550_v57  ;;  %v569_v12 = vcombine.low %v403_v6, %v407_v7 }
  0x75   : > { %v567_v0 = vrot.slane %v553_v58, %v1111_v17  ;;  %v570_v2 = vcombine.low %v411_v61, %v415_v9 }
  0x76   : > { %612 = vst [vmem:[%s1147_s23 + $0x30] sm:$0xff] %v602_v62  ;;  %v603_v3 = vadd.f32 %v551_v63, %v237_v8  ;;  %v577_v13 = vrot.slane %v569_v12, %v1111_v17 }
  0x77   : > { %v568_v5 = vcombine.low %v560_v59, %v567_v0  ;;  %v584_v10 = vrot.slane %v570_v2, %v1111_v17 }
  0x78   : > { %613 = vst [vmem:[%s1147_s23 + $0x38] sm:$0xff] %v603_v3 }
  0x79   : > { %v604_v14 = vadd.f32 %v568_v5, %v238_v1  ;;  %v585_v11 = vcombine.low %v577_v13, %v584_v10 }
  0x7b   : > { %614 = vst [vmem:[%s1147_s23 + $0x40] sm:$0xff] %v604_v14  ;;  %v605_v15 = vadd.f32 %v585_v11, %v239_v60 }
  0x7d   : > { %615 = vst [vmem:[%s1147_s23 + $0x48] sm:$0xff] %v605_v15 }
  0x7e   : > { %861 = shalt.err (!%p858_p4)
}
  0x7f   : > { %s862_s6 = scalar_lea.hbm %s629_s21, 1280  ;;  %s866_s12 = scalar_lea.hbm %s1249_s3, 2560 }
  0x80   : > { %p863_p9 = scmp.ne.s32.totalorder %s629_s21, %s862_s6  ;;  %p867_p11 = scmp.lt.s32.totalorder %s629_s21, %s1249_s3 }
  0x81   : > { %p868_p12 = scmp.lt.s32.totalorder %s866_s12, %s862_s6 }
  0x82   : > { %p864_p0 = pnand %p863_p9, %p1261_p1 }
  0x83   : > { %p869_p3 = por %p868_p12, %p867_p11 }
  0x84   : > { %p865_p6 = pneg %p864_p0 }
  0x86   : > { %p870_p13 = pnand %p869_p3, %p865_p6 }
  0x88   : > { %873 = shalt.err (!%p870_p13)
}
  0x89   : > { %744 = dma.vmem_to_hbm [thread:$0]  (%p1261_p1), %s632_s8, 1280, %s629_s21, %s617_s27  }
  0x8a PF: > { %s643_s29 = sand.u32 1, %s904_s14   ;;  %p1262_p7 = scmp.ne.s32.totalorder %s1254_s25, 0 }
  0x8b   : > { %p1263_p5 = scmp.ge.s32.totalorder %s916_s17, 2  ;;  %s644_s11 = scalar_lea.sflag [#allocation5], %s643_s29 }
  0x8d   : > { %p754_p8 = pnand %p1263_p5, %p1262_p7 }
  0x8f   : > { %p755_p10 = pneg %p754_p8 }
  0x91   : > { %899 = dma.done.wait (%p755_p10), %s644_s11, 1280  }
  0x92   : > { %901 = vsyncadd (%p755_p10), %s644_s11, 4294966016  ;;  %p20_p2 = scmp.ge.s32.totalorder %s970_s19, 4   ;;  %s1264_s14 = smov %s908_s15 }
  0x93   : > { %s1265_s15 = smov %s912_s16  ;;  %s1266_s16 = smov %s982_s22 }
  0x94   : > { %s1267_s17 = smov %s970_s19  ;;  %22 = sbr.rel (!%p20_p2) target bundleno = 9 (0x9), region = 90 }
  0x99   :  { %649 = vsyncpa [#allocation4], 1 }
  0x9a   :  { %651 = vsyncpa [#allocation4 + $0x1], 1 }
  0x9b   :  { %652 = vsyncpa [#allocation7], 1 }
  0x9c   :  { %654 = vsyncpa [#allocation7 + $0x1], 1 }
  0x9d   :  { %655 = vsyncpa [#allocation5], 1 }
  0x9e   :  { %657 = vsyncpa [#allocation5 + $0x1], 1 }

</bundles_post_ra>
